<compile_context>
chip_gen: v5e
topology: v5e:2x2
jax: 0.10.0
libtpu: 0.0.40
codegen_flags: <defaults>
</compile_context>

<pallas_src>
import functools

import jax
import jax.numpy as jnp
from jax import lax
from jax.experimental import pallas as pl
from jax.experimental.pallas import tpu as pltpu

EPS = 1e-8
# Explicit f32-accuracy matmuls (multi-pass bf16 on the MXU); used in both the
# kernel and the reference so they match bit-for-bit in rounding behavior.
_MM_PRECISION = lax.Precision.HIGHEST


def _jpose_kernel(x_ref, w1_ref, b1_ref, w2_ref, b2_ref, o_ref, *, matmul_dtype):
    # x_ref: (tb, D_in); w1_ref: (D_in, D_out); b1_ref: (1, D_out)
    # w2_ref: (D_out, D_out); b2_ref: (1, D_out); o_ref: (tb, D_out)
    x = x_ref[...].astype(jnp.float32)

    # First L1 normalization ("l2_norm" in the module): per-row reciprocal,
    # folded past the first matmul so the multiply runs at D_out width.
    inv0 = pl.reciprocal(
        jnp.sum(jnp.abs(x), axis=1, keepdims=True) + EPS, approx=False)

    h = jnp.dot(x.astype(matmul_dtype), w1_ref[...],
                preferred_element_type=jnp.float32, precision=_MM_PRECISION)
    h = h * inv0 + b1_ref[...].astype(jnp.float32)

    # relu(linear2(h))
    h = jnp.dot(h.astype(matmul_dtype), w2_ref[...],
                preferred_element_type=jnp.float32, precision=_MM_PRECISION)
    h = jnp.maximum(h + b2_ref[...].astype(jnp.float32), 0.0)

    # Final L1 normalization.
    inv1 = pl.reciprocal(
        jnp.sum(jnp.abs(h), axis=1, keepdims=True) + EPS, approx=False)
    o_ref[...] = (h * inv1).astype(o_ref.dtype)


def _jpose_fused_kernel(x_ref, w12_ref, b12_ref, o_ref, *, matmul_dtype):
    # Fused linears: relu((x_n @ W1 + b1) @ W2 + b2)
    #              == relu(x_n @ (W1 @ W2) + (b1 @ W2 + b2)).
    x = x_ref[...].astype(jnp.float32)
    inv0 = pl.reciprocal(
        jnp.sum(jnp.abs(x), axis=1, keepdims=True) + EPS, approx=False)

    h = jnp.dot(x.astype(matmul_dtype), w12_ref[...],
                preferred_element_type=jnp.float32, precision=_MM_PRECISION)
    h = jnp.maximum(h * inv0 + b12_ref[...].astype(jnp.float32), 0.0)

    inv1 = pl.reciprocal(
        jnp.sum(jnp.abs(h), axis=1, keepdims=True) + EPS, approx=False)
    o_ref[...] = (h * inv1).astype(o_ref.dtype)


def _round_up(n, m):
    return ((n + m - 1) // m) * m


def jpose_forward(x, w1, b1, w2, b2, *, tb=None, matmul_dtype=jnp.float32,
                  fuse_linears=False):
    B, D_in = x.shape
    D_out = w1.shape[1]

    # Tile choice:
    #  * tiny batch -> single full-extent block, no pipeline overhead;
    #  * larger batch -> >= 2 blocks (v7x has two TensorCores on the
    #    "parallel" axis), capped at 1024 rows (near HBM roofline), multiple
    #    of 8 for the f32 sublane tiling.  Ragged trailing block is handled
    #    by Pallas read-padding / write-masking — rows are independent so the
    #    masked rows cannot contaminate valid output rows.
    if tb is None:
        if B <= 256:
            tb = B
        else:
            tb = min(1024, _round_up(pl.cdiv(B, 2), 8))
    n_blocks = pl.cdiv(B, tb)

    if fuse_linears:
        # Precompute once in the wrapper (free when weights are jit-constant).
        w12 = jnp.dot(w1, w2, precision=_MM_PRECISION).astype(matmul_dtype)
        b12 = (jnp.dot(b1, w2, precision=_MM_PRECISION) + b2).astype(jnp.float32)
        kernel = functools.partial(_jpose_fused_kernel, matmul_dtype=matmul_dtype)
        in_specs = [
            pl.BlockSpec((tb, D_in), lambda i: (i, 0)),      # x tile
            pl.BlockSpec((D_in, D_out), lambda i: (0, 0)),   # W12 (resident)
            pl.BlockSpec((1, D_out), lambda i: (0, 0)),      # b12 (resident)
        ]
        args = (x, w12, b12)
    else:
        kernel = functools.partial(_jpose_kernel, matmul_dtype=matmul_dtype)
        in_specs = [
            pl.BlockSpec((tb, D_in), lambda i: (i, 0)),      # x tile
            pl.BlockSpec((D_in, D_out), lambda i: (0, 0)),   # W1 (resident)
            pl.BlockSpec((1, D_out), lambda i: (0, 0)),      # b1 (resident)
            pl.BlockSpec((D_out, D_out), lambda i: (0, 0)),  # W2 (resident)
            pl.BlockSpec((1, D_out), lambda i: (0, 0)),      # b2 (resident)
        ]
        args = (x, w1.astype(matmul_dtype), b1.astype(jnp.float32),
                w2.astype(matmul_dtype), b2.astype(jnp.float32))

    return pl.pallas_call(
        kernel,
        out_shape=jax.ShapeDtypeStruct((B, D_out), x.dtype),
        grid_spec=pltpu.PrefetchScalarGridSpec(
            num_scalar_prefetch=0,
            grid=(n_blocks,),
            in_specs=in_specs,
            out_specs=pl.BlockSpec((tb, D_out), lambda i: (i, 0)),
        ),
        compiler_params=pltpu.CompilerParams(
            dimension_semantics=("parallel",)),
    )(*args)


def jpose_reference(x, w1, b1, w2, b2):
    x = x.astype(jnp.float32)
    x = x / (jnp.sum(jnp.abs(x), axis=1, keepdims=True) + EPS)
    h = jnp.dot(x, w1, precision=_MM_PRECISION) + b1
    h = jnp.maximum(jnp.dot(h, w2, precision=_MM_PRECISION) + b2, 0.0)
    return h / (jnp.sum(jnp.abs(h), axis=1, keepdims=True) + EPS)


if __name__ == "__main__":
    # Small shapes consistent with the module: (batch, input_size) input.
    batch, input_size, output_size = 16, 256, 128

    key = jax.random.PRNGKey(0)
    kx, k1w, k1b, k2w, k2b, kx2 = jax.random.split(key, 6)

    x = jax.random.normal(kx, (batch, input_size), dtype=jnp.float32)

    # Deterministic PyTorch-Linear-style init: U(-1/sqrt(fan_in), 1/sqrt(fan_in)).
    bound1 = 1.0 / jnp.sqrt(float(input_size))
    w1 = jax.random.uniform(k1w, (input_size, output_size),
                            minval=-bound1, maxval=bound1, dtype=jnp.float32)
    b1 = jax.random.uniform(k1b, (1, output_size),
                            minval=-bound1, maxval=bound1, dtype=jnp.float32)

    bound2 = 1.0 / jnp.sqrt(float(output_size))
    w2 = jax.random.uniform(k2w, (output_size, output_size),
                            minval=-bound2, maxval=bound2, dtype=jnp.float32)
    b2 = jax.random.uniform(k2b, (1, output_size),
                            minval=-bound2, maxval=bound2, dtype=jnp.float32)

    ref = jpose_reference(x, w1, b1, w2, b2)

    # 1) Default path: single block (grid=(1,)), two resident matmuls, f32.
    out = jax.block_until_ready(jpose_forward(x, w1, b1, w2, b2))
    assert out.shape == (batch, output_size)
    assert jnp.allclose(out, ref, atol=1e-5, rtol=1e-5)

    # 2) Fused-linear path (W12 = W1 @ W2, b12 = b1 @ W2 + b2).
    out_fused = jax.block_until_ready(
        jpose_forward(x, w1, b1, w2, b2, fuse_linears=True))
    assert jnp.allclose(out_fused, ref, atol=1e-5, rtol=1e-5)

    # 3) Ragged, multi-block batch: exercises grid=(2,) with a partial
    #    trailing block handled by Pallas masking (no wrapper pad/slice).
    batch2 = 300
    x2 = jax.random.normal(kx2, (batch2, input_size), dtype=jnp.float32)
    ref2 = jpose_reference(x2, w1, b1, w2, b2)
    out2 = jax.block_until_ready(jpose_forward(x2, w1, b1, w2, b2))
    assert out2.shape == (batch2, output_size)
    assert jnp.allclose(out2, ref2, atol=1e-5, rtol=1e-5)

    print("KERNEL_OK")
</pallas_src>

<mosaic_0001>
module attributes {stable_mosaic.version = 11 : i64} {
  func.func @_jpose_kernel(%arg0: i32, %arg1: memref<16x256xf32, #tpu.memory_space<vmem>>, %arg2: memref<256x128xf32, #tpu.memory_space<vmem>>, %arg3: memref<1x128xf32, #tpu.memory_space<vmem>>, %arg4: memref<128x128xf32, #tpu.memory_space<vmem>>, %arg5: memref<1x128xf32, #tpu.memory_space<vmem>>, %arg6: memref<16x128xf32, #tpu.memory_space<vmem>>) attributes {dimension_semantics = [#tpu.dimension_semantics<parallel>], iteration_bounds = array<i64: 1>, scalar_prefetch = 0 : i64, scratch_operands = 0 : i64, tpu.core_type = #tpu.core_type<tc>, window_params = [{transform_indices = @transform_0, window_bounds = array<i64: 16, 256>}, {pipeline_mode = #tpu.pipeline_mode<synchronous>, transform_indices = @transform_1, window_bounds = array<i64: 256, 128>}, {pipeline_mode = #tpu.pipeline_mode<synchronous>, transform_indices = @transform_2, window_bounds = array<i64: 1, 128>}, {pipeline_mode = #tpu.pipeline_mode<synchronous>, transform_indices = @transform_3, window_bounds = array<i64: 128, 128>}, {pipeline_mode = #tpu.pipeline_mode<synchronous>, transform_indices = @transform_4, window_bounds = array<i64: 1, 128>}, {transform_indices = @transform_5, window_bounds = array<i64: 16, 128>}]} {
    %c0 = arith.constant 0 : index
    %c0_0 = arith.constant 0 : index
    %0 = vector.load %arg1[%c0, %c0_0] : memref<16x256xf32, #tpu.memory_space<vmem>>, vector<16x256xf32>
    %1 = math.absf %0 : vector<16x256xf32>
    %cst = arith.constant dense<0.000000e+00> : vector<16xf32>
    %2 = vector.multi_reduction <add>, %1, %cst [1] : vector<16x256xf32> to vector<16xf32>
    %3 = vector.shape_cast %2 : vector<16xf32> to vector<16x1xf32>
    %cst_1 = arith.constant 9.99999993E-9 : f32
    %4 = vector.broadcast %cst_1 : f32 to vector<16x1xf32>
    %5 = arith.addf %3, %4 : vector<16x1xf32>
    %6 = tpu.reciprocal %5 : vector<16x1xf32> -> vector<16x1xf32>
    %c0_2 = arith.constant 0 : index
    %c0_3 = arith.constant 0 : index
    %7 = vector.load %arg2[%c0_2, %c0_3] : memref<256x128xf32, #tpu.memory_space<vmem>>, vector<256x128xf32>
    %cst_4 = arith.constant dense<0.000000e+00> : vector<16x128xf32>
    %8 = tpu.matmul %0, %7, %cst_4 {dimension_numbers = #tpu.dot_dimension_numbers<[1], [0], [0], [1], [0, 0, 1, 1], [], []>, precision = #tpu.contract_precision<fp32>} : vector<16x256xf32>, vector<256x128xf32>, vector<16x128xf32> -> vector<16x128xf32>
    %9 = vector.broadcast %6 : vector<16x1xf32> to vector<16x128xf32>
    %10 = arith.mulf %8, %9 : vector<16x128xf32>
    %c0_5 = arith.constant 0 : index
    %c0_6 = arith.constant 0 : index
    %11 = vector.load %arg3[%c0_5, %c0_6] : memref<1x128xf32, #tpu.memory_space<vmem>>, vector<1x128xf32>
    %12 = vector.broadcast %11 : vector<1x128xf32> to vector<16x128xf32>
    %13 = arith.addf %10, %12 : vector<16x128xf32>
    %c0_7 = arith.constant 0 : index
    %c0_8 = arith.constant 0 : index
    %14 = vector.load %arg4[%c0_7, %c0_8] : memref<128x128xf32, #tpu.memory_space<vmem>>, vector<128x128xf32>
    %cst_9 = arith.constant dense<0.000000e+00> : vector<16x128xf32>
    %15 = tpu.matmul %13, %14, %cst_9 {dimension_numbers = #tpu.dot_dimension_numbers<[1], [0], [0], [1], [0, 0, 1, 1], [], []>, precision = #tpu.contract_precision<fp32>} : vector<16x128xf32>, vector<128x128xf32>, vector<16x128xf32> -> vector<16x128xf32>
    %c0_10 = arith.constant 0 : index
    %c0_11 = arith.constant 0 : index
    %16 = vector.load %arg5[%c0_10, %c0_11] : memref<1x128xf32, #tpu.memory_space<vmem>>, vector<1x128xf32>
    %17 = vector.broadcast %16 : vector<1x128xf32> to vector<16x128xf32>
    %18 = arith.addf %15, %17 : vector<16x128xf32>
    %cst_12 = arith.constant 0.000000e+00 : f32
    %19 = vector.broadcast %cst_12 : f32 to vector<16x128xf32>
    %20 = arith.maximumf %18, %19 : vector<16x128xf32>
    %21 = math.absf %20 : vector<16x128xf32>
    %cst_13 = arith.constant dense<0.000000e+00> : vector<16xf32>
    %22 = vector.multi_reduction <add>, %21, %cst_13 [1] : vector<16x128xf32> to vector<16xf32>
    %23 = vector.shape_cast %22 : vector<16xf32> to vector<16x1xf32>
    %cst_14 = arith.constant 9.99999993E-9 : f32
    %24 = vector.broadcast %cst_14 : f32 to vector<16x1xf32>
    %25 = arith.addf %23, %24 : vector<16x1xf32>
    %26 = tpu.reciprocal %25 : vector<16x1xf32> -> vector<16x1xf32>
    %27 = vector.broadcast %26 : vector<16x1xf32> to vector<16x128xf32>
    %28 = arith.mulf %20, %27 : vector<16x128xf32>
    %c0_15 = arith.constant 0 : index
    %c0_16 = arith.constant 0 : index
    %29 = vector.load %arg6[%c0_15, %c0_16] : memref<16x128xf32, #tpu.memory_space<vmem>>, vector<16x128xf32>
    tpu.vector_store %arg6[%c0_15, %c0_16], %28 {strides = array<i32>} : memref<16x128xf32, #tpu.memory_space<vmem>>, vector<16x128xf32>,
    return
  }
  func.func @transform_0(%arg0: i32) -> (i32, i32) {
    %c0_i32 = arith.constant 0 : i32
    %c0_i32_0 = arith.constant 0 : i32
    return %arg0, %c0_i32 : i32, i32
  }
  func.func @transform_1(%arg0: i32) -> (i32, i32) {
    %c0_i32 = arith.constant 0 : i32
    %c0_i32_0 = arith.constant 0 : i32
    %c0_i32_1 = arith.constant 0 : i32
    return %c0_i32, %c0_i32_0 : i32, i32
  }
  func.func @transform_2(%arg0: i32) -> (i32, i32) {
    %c0_i32 = arith.constant 0 : i32
    %c0_i32_0 = arith.constant 0 : i32
    %c0_i32_1 = arith.constant 0 : i32
    return %c0_i32, %c0_i32_0 : i32, i32
  }
  func.func @transform_3(%arg0: i32) -> (i32, i32) {
    %c0_i32 = arith.constant 0 : i32
    %c0_i32_0 = arith.constant 0 : i32
    %c0_i32_1 = arith.constant 0 : i32
    return %c0_i32, %c0_i32_0 : i32, i32
  }
  func.func @transform_4(%arg0: i32) -> (i32, i32) {
    %c0_i32 = arith.constant 0 : i32
    %c0_i32_0 = arith.constant 0 : i32
    %c0_i32_1 = arith.constant 0 : i32
    return %c0_i32, %c0_i32_0 : i32, i32
  }
  func.func @transform_5(%arg0: i32) -> (i32, i32) {
    %c0_i32 = arith.constant 0 : i32
    %c0_i32_0 = arith.constant 0 : i32
    return %arg0, %c0_i32 : i32, i32
  }
}

</mosaic_0001>

<bundles_post_ra>
// kernel: tpu_custom_call.1
= control target key start
LH: loop header
LB: loop body
LE: loop exit
PB: predicated region body
PF: predicated region fallthrough
CT: control target
= control target key end

     0   :  { %10 = vsyncpa [#allocation3], 0  ;;  %s2333_s0 = inlined_call_operand.hbm [shape: f32[16,256], index: 0, kind: input, shape index: {}]   ;;  %s2334_s1 = inlined_call_operand.hbm [shape: f32[256,128], index: 1, kind: input, shape index: {}]   ;;  %s2335_s2 = inlined_call_operand.vmem [shape: f32[1,128], index: 2, kind: input, shape index: {}]   ;;  %s2336_s3 = inlined_call_operand.hbm [shape: f32[128,128], index: 3, kind: input, shape index: {}]   ;;  %s2337_s4 = inlined_call_operand.vmem [shape: f32[1,128], index: 4, kind: input, shape index: {}]   ;;  %s2338_s5 = inlined_call_operand.hbm [shape: f32[16,128], index: 5, kind: output, shape index: {}]  }
   0x1   :  { %11 = vsyncpa [#allocation6], 0  ;;  %s30_s20 = sshll.u32 %s2334_s1, 4  ;;  %s31_s20 = int_to_ptr.hbm [resolvable:$true] %s30_s20 }
   0x2   :  { %12 = vsyncpa [#allocation4], 0  ;;  %s1502_s21 = smov [#allocation5]   ;;  %s17_s25 = sshll.u32 %s2333_s0, 4  ;;  %s18_s25 = int_to_ptr.hbm [resolvable:$true] %s17_s25 }
   0x3   :  { %s32_s22 = sshll.u32 %s1502_s21, 4  ;;  %s1503_s26 = smov 128   ;;  %s33_s22 = int_to_ptr.vmem [resolvable:$true] %s32_s22 }
   0x4   :  { %s1504_s27 = smov 8   ;;  %s1505_s28 = smov [#allocation2]  }
   0x5   :  { %38 = dma.hbm_to_vmem [thread:$0]  %s31_s20, 4096, %s33_s22, [#allocation6], %s1503_s26, %s1503_s26, %s1504_s27  }
   0x6   :  { %s19_s29 = sshll.u32 %s1505_s28, 4  ;;  %s1506_s1 = smov 256   ;;  %s20_s29 = int_to_ptr.vmem [resolvable:$true] %s19_s29 }
   0x7   :  { %s1507_s30 = smov 16   ;;  %s45_s8 = sshll.u32 %s2336_s3, 4  ;;  %s46_s8 = int_to_ptr.hbm [resolvable:$true] %s45_s8 }
   0x8   :  { %25 = dma.hbm_to_vmem [thread:$0]  %s18_s25, 512, %s20_s29, [#allocation3], %s1506_s1, %s1506_s1, %s1507_s30  }
   0x9   :  { %s1508_s9 = smov [#allocation7]  }
   0xa   :  { %s47_s0 = sshll.u32 %s1508_s9, 4  ;;  %s48_s0 = int_to_ptr.vmem [resolvable:$true] %s47_s0 }
   0xb   :  { %53 = dma.hbm_to_vmem [thread:$0]  %s46_s8, 2048, %s48_s0, [#allocation6], %s1503_s26, %s1503_s26, %s1504_s27  }
   0xc   :  { %1496 = dma.done.wait [#allocation3], 512  }
   0xd   :  { %1497 = vsyncadd [#allocation3], 4294966784 }
   0xe   :  { %1498 = dma.done.wait [#allocation6], 6144  }
   0xf   :  { %1499 = vsyncadd [#allocation6], 4294961152  ;;  %v127_v0 = vld [vmem:[#allocation5 + $0x78] sm:$0xff]  ;;  %v126_v1 = vld [vmem:[#allocation5 + $0x70] sm:$0xff]  ;;  %s1336_s15 = sshll.u32 %s2338_s5, 4  ;;  %s1337_s15 = int_to_ptr.hbm [resolvable:$true] %s1336_s15 }
  0x10   :  { %v125_v2 = vld [vmem:[#allocation5 + $0x68] sm:$0xff]  ;;  %v1555_v3 = vand.u32 4294901760, %v127_v0  ;;  %v1557_v4 = vand.u32 4294901760, %v126_v1  ;;  %v124_v6 = vld [vmem:[#allocation5 + $0x60] sm:$0xff]  ;;  %v123_v7 = vld [vmem:[#allocation5 + $0x58] sm:$0xff] }
  0x11   :  { %v1559_v5 = vand.u32 4294901760, %v125_v2  ;;  %v122_v8 = vld [vmem:[#allocation5 + $0x50] sm:$0xff]  ;;  %v1561_v9 = vand.u32 4294901760, %v124_v6  ;;  %v1563_v10 = vand.u32 4294901760, %v123_v7  ;;  %v121_v12 = vld [vmem:[#allocation5 + $0x48] sm:$0xff]  ;;  %v120_v13 = vld [vmem:[#allocation5 + $0x40] sm:$0xff] }
  0x12   :  { %v1565_v11 = vand.u32 4294901760, %v122_v8  ;;  %145 = vmatpush.msra.mxu0 %v1555_v3  ;;  %v1569_v14 = vsub.f32 %v127_v0, %v1555_v3  ;;  %v1572_v15 = vsub.f32 %v126_v1, %v1557_v4  ;;  %358 = vmatpush.msra.mxu3 %v1555_v3  ;;  %v1578_v17 = vand.u32 4294901760, %v121_v12  ;;  %v119_v18 = vld [vmem:[#allocation5 + $0x38] sm:$0xff]  ;;  %v118_v26 = vld [vmem:[#allocation5 + $0x30] sm:$0xff]  ;;  %v117_v36 = vld [vmem:[#allocation5 + $0x28] sm:$0xff] }
  0x13   :  { %v1576_v16 = vsub.f32 %v125_v2, %v1559_v5  ;;  %v1581_v19 = vsub.f32 %v124_v6, %v1561_v9  ;;  %v1584_v20 = vsub.f32 %v123_v7, %v1563_v10  ;;  %v1594_v25 = vand.u32 4294901760, %v120_v13  ;;  %v116_v42 = vld [vmem:[#allocation5 + $0x20] sm:$0xff]  ;;  %v115_v48 = vld [vmem:[#allocation5 + $0x18] sm:$0xff]  ;;  %v114_v54 = vld [vmem:[#allocation5 + $0x10] sm:$0xff] }
  0x14   :  { %v1587_v21 = vsub.f32 %v122_v8, %v1565_v11  ;;  %147 = vmatpush.msra.mxu0 %v1557_v4  ;;  %300 = vmatpush.msra.mxu2 %v1569_v14  ;;  %v195_v22 = vand.u32 4294901760, %v1569_v14  ;;  %v2355_v23 = vand.u32 4294901760, %v1572_v15  ;;  %v1598_v28 = vand.u32 4294901760, %v119_v18  ;;  %v143_v59 = vld [vmem:[#allocation5 + $0xf8] sm:$0xff]  ;;  %v113_v61 = vld [vmem:[#allocation5 + $0x8] sm:$0xff]  ;;  %v112_v2 = vld [vmem:[#allocation5] sm:$0xff] }
  0x15   :  { %v2352_v24 = vand.u32 4294901760, %v1576_v16  ;;  %360 = vmatpush.msra.mxu3 %v1557_v4  ;;  %v2351_v27 = vand.u32 4294901760, %v1581_v19  ;;  %v1601_v29 = vsub.f32 %v121_v12, %v1578_v17  ;;  %v2348_v33 = vand.u32 4294901760, %v1584_v20  ;;  %v142_v6 = vld [vmem:[#allocation5 + $0xf0] sm:$0xff] }
  0x16   :  { %149 = vmatpush.msra.mxu0 %v1559_v5  ;;  %303 = vmatpush.msra.mxu2 %v1572_v15  ;;  %v196_v30 = vsub.f32 %v1569_v14, %v195_v22  ;;  %v202_v31 = vsub.f32 %v1572_v15, %v2355_v23  ;;  %v1616_v34 = vand.u32 4294901760, %v118_v26  ;;  %v2347_v35 = vand.u32 4294901760, %v1587_v21  ;;  %v134_v23 = vld [vmem:[#allocation5 + $0xb0] sm:$0xff] }
  0x17   :  { %v208_v32 = vsub.f32 %v1576_v16, %v2352_v24  ;;  %362 = vmatpush.msra.mxu3 %v1559_v5  ;;  %v214_v39 = vsub.f32 %v1581_v19, %v2351_v27  ;;  %v1625_v40 = vsub.f32 %v120_v13, %v1594_v25  ;;  %v2345_v41 = vand.u32 4294901760, %v1601_v29 }
  0x18   :  { %151 = vmatpush.msra.mxu0 %v1561_v9  ;;  %v197_v37 = vand.u32 4294901760, %v196_v30  ;;  %306 = vmatpush.msra.mxu2 %v1576_v16  ;;  %v203_v38 = vand.u32 4294901760, %v202_v31  ;;  %v220_v44 = vsub.f32 %v1584_v20, %v2348_v33  ;;  %v1633_v45 = vand.u32 4294901760, %v117_v36  ;;  %v141_v30 = vld [vmem:[#allocation5 + $0xe8] sm:$0xff] }
  0x19   :  { %364 = vmatpush.msra.mxu3 %v1561_v9  ;;  %v209_v43 = vand.u32 4294901760, %v208_v32  ;;  %v1636_v46 = vsub.f32 %v119_v18, %v1598_v28  ;;  %v226_v47 = vsub.f32 %v1587_v21, %v2347_v35  ;;  %v215_v49 = vand.u32 4294901760, %v214_v39 }
  0x1a   :  { %153 = vmatpush.msra.mxu0 %v1563_v10  ;;  %198 = vmatpush.msra.mxu1 %v197_v37  ;;  %v1644_v50 = vand.u32 4294901760, %v116_v42  ;;  %v2344_v51 = vand.u32 4294901760, %v1625_v40  ;;  %v1648_v52 = vsub.f32 %v118_v26, %v1616_v34  ;;  %v232_v53 = vsub.f32 %v1601_v29, %v2345_v41 }
  0x1b   :  { %309 = vmatpush.msra.mxu2 %v1581_v19  ;;  %366 = vmatpush.msra.mxu3 %v1563_v10  ;;  %v221_v55 = vand.u32 4294901760, %v220_v44  ;;  %v1656_v56 = vand.u32 4294901760, %v115_v48  ;;  %v2342_v57 = vand.u32 4294901760, %v1636_v46  ;;  %v1660_v58 = vsub.f32 %v117_v36, %v1633_v45  ;;  %v140_v44 = vld [vmem:[#allocation5 + $0xe0] sm:$0xff] }
  0x1c   :  { %155 = vmatpush.msra.mxu0 %v1565_v11  ;;  %204 = vmatpush.msra.mxu1 %v203_v38  ;;  %v227_v60 = vand.u32 4294901760, %v226_v47  ;;  %v238_v62 = vsub.f32 %v1625_v40, %v2344_v51  ;;  %v1668_v63 = vand.u32 4294901760, %v114_v54  ;;  %v2341_v0 = vand.u32 4294901760, %v1648_v52 }
  0x1d   :  { %312 = vmatpush.msra.mxu2 %v1584_v20  ;;  %368 = vmatpush.msra.mxu3 %v1565_v11  ;;  %v1672_v1 = vsub.f32 %v116_v42, %v1644_v50  ;;  %v233_v7 = vand.u32 4294901760, %v232_v53  ;;  %v1676_v8 = vand.u32 4294901760, %v143_v59  ;;  %v244_v12 = vsub.f32 %v1636_v46, %v2342_v57  ;;  %v137_v57 = vld [vmem:[#allocation5 + $0xc8] sm:$0xff] }
  0x1e   :  { %157 = vmatpush.msra.mxu0 %v1578_v17  ;;  %210 = vmatpush.msra.mxu1 %v209_v43  ;;  %v1682_v13 = vand.u32 4294901760, %v113_v61  ;;  %v2340_v18 = vand.u32 4294901760, %v1660_v58  ;;  %v1686_v26 = vsub.f32 %v115_v48, %v1656_v56  ;;  %v1690_v31 = vand.u32 4294901760, %v112_v2 }
  0x1f   :  { %315 = vmatpush.msra.mxu2 %v1587_v21  ;;  %370 = vmatpush.msra.mxu3 %v1578_v17  ;;  %v1692_v32 = vand.u32 4294901760, %v142_v6  ;;  %v239_v36 = vand.u32 4294901760, %v238_v62  ;;  %v250_v37 = vsub.f32 %v1648_v52, %v2341_v0  ;;  %v2339_v38 = vand.u32 4294901760, %v1672_v1 }
  0x20   :  { %159 = vmatpush.msra.mxu0 %v1594_v25  ;;  %216 = vmatpush.msra.mxu1 %v215_v49  ;;  %2362 = vst [vmem:[#allocation12_spill] sm:$0xff] %v1690_v31  ;;  %v1700_v39 = vsub.f32 %v114_v54, %v1668_v63  ;;  %v1705_v42 = vsub.f32 %v143_v59, %v1676_v8  ;;  %v1707_v43 = vand.u32 4294901760, %v141_v30  ;;  %v245_v47 = vand.u32 4294901760, %v244_v12  ;;  %v139_v59 = vld [vmem:[#allocation5 + $0xd8] sm:$0xff]  ;;  %v138_v12 = vld [vmem:[#allocation5 + $0xd0] sm:$0xff] }
  0x21   :  { %318 = vmatpush.msra.mxu2 %v1601_v29  ;;  %372 = vmatpush.msra.mxu3 %v1594_v25  ;;  %v256_v48 = vsub.f32 %v1660_v58, %v2340_v18  ;;  %v2343_v49 = vand.u32 4294901760, %v1686_v26  ;;  %v1715_v53 = vsub.f32 %v113_v61, %v1682_v13  ;;  %v1720_v54 = vsub.f32 %v112_v2, %v1690_v31 }
  0x22   :  { %161 = vmatpush.msra.mxu0 %v1598_v28  ;;  %222 = vmatpush.msra.mxu1 %v221_v55  ;;  %v1723_v55 = vsub.f32 %v142_v6, %v1692_v32  ;;  %v262_v61 = vsub.f32 %v1672_v1, %v2339_v38  ;;  %v2346_v62 = vand.u32 4294901760, %v1700_v39  ;;  %v2349_v2 = vand.u32 4294901760, %v1705_v42 }
  0x23   :  { %321 = vmatpush.msra.mxu2 %v1625_v40  ;;  %374 = vmatpush.msra.mxu3 %v1598_v28  ;;  %v1736_v6 = vsub.f32 %v141_v30, %v1707_v43  ;;  %v2350_v38 = vand.u32 4294901760, %v1715_v53  ;;  %v1743_v18 = vand.u32 4294901760, %v139_v59  ;;  %v2353_v30 = vand.u32 4294901760, %v1720_v54 }
  0x24   :  { %163 = vmatpush.msra.mxu0 %v1616_v34  ;;  %228 = vmatpush.msra.mxu1 %v227_v60  ;;  %v251_v60 = vand.u32 4294901760, %v250_v37  ;;  %v268_v37 = vsub.f32 %v1686_v26, %v2343_v49  ;;  %v2354_v0 = vand.u32 4294901760, %v1723_v55  ;;  %v1756_v51 = vand.u32 4294901760, %v138_v12 }
  0x25   :  { %324 = vmatpush.msra.mxu2 %v1636_v46  ;;  %376 = vmatpush.msra.mxu3 %v1616_v34  ;;  %v568_v41 = vsub.f32 %v1705_v42, %v2349_v2  ;;  %v1769_v35 = vsub.f32 %v139_v59, %v1743_v18  ;;  %v1771_v33 = vand.u32 4294901760, %v137_v57  ;;  %v286_v2 = vsub.f32 %v1720_v54, %v2353_v30 }
  0x26   :  { %165 = vmatpush.msra.mxu0 %v1633_v45  ;;  %234 = vmatpush.msra.mxu1 %v233_v7  ;;  %v1730_v7 = vand.u32 4294901760, %v140_v44  ;;  %v1784_v27 = vsub.f32 %v138_v12, %v1756_v51  ;;  %v2363_v14 = vand.u32 4294901760, %v1572_v15  ;;  %v1814_v15 = vand.u32 4294901760, %v134_v23 }
  0x27   :  { %327 = vmatpush.msra.mxu2 %v1648_v52  ;;  %378 = vmatpush.msra.mxu3 %v1633_v45  ;;  %v569_v30 = vand.u32 4294901760, %v568_v41 }
  0x28   :  { %167 = vmatpush.msra.mxu0 %v1644_v50  ;;  %240 = vmatpush.msra.mxu1 %v239_v36  ;;  %v257_v36 = vand.u32 4294901760, %v256_v48  ;;  %v274_v48 = vsub.f32 %v1700_v39, %v2346_v62  ;;  %v1754_v49 = vsub.f32 %v140_v44, %v1730_v7  ;;  %v269_v62 = vand.u32 4294901760, %v268_v37  ;;  %v135_v37 = vld [vmem:[#allocation5 + $0xb8] sm:$0xff] }
  0x29   :  { %330 = vmatpush.msra.mxu2 %v1660_v58  ;;  %380 = vmatpush.msra.mxu3 %v1644_v50  ;;  %v280_v44 = vsub.f32 %v1715_v53, %v2350_v38  ;;  %v1799_v38 = vand.u32 4294901760, %v135_v37 }
  0x2a   :  { %169 = vmatpush.msra.mxu0 %v1656_v56  ;;  %246 = vmatpush.msra.mxu1 %v245_v47  ;;  %v263_v47 = vand.u32 4294901760, %v262_v61  ;;  %v136_v61 = vld [vmem:[#allocation5 + $0xc0] sm:$0xff]  ;;  %v275_v59 = vand.u32 4294901760, %v274_v48  ;;  %v1797_v48 = vsub.f32 %v137_v57, %v1771_v33 }
  0x2b   :  { %333 = vmatpush.msra.mxu2 %v1672_v1  ;;  %382 = vmatpush.msra.mxu3 %v1656_v56  ;;  %v1786_v24 = vand.u32 4294901760, %v136_v61  ;;  %v1824_v57 = vsub.f32 %v135_v37, %v1799_v38  ;;  %v1837_v37 = vsub.f32 %v134_v23, %v1814_v15 }
  0x2c   :  { %171 = vmatpush.msra.mxu0 %v1668_v63  ;;  %252 = vmatpush.msra.mxu1 %v251_v60  ;;  %v2356_v60 = vand.u32 4294901760, %v1736_v6 }
  0x2d   :  { %336 = vmatpush.msra.mxu2 %v1686_v26  ;;  %384 = vmatpush.msra.mxu3 %v1668_v63  ;;  %v1812_v12 = vsub.f32 %v136_v61, %v1786_v24 }
  0x2e   :  { %173 = vmatpush.msra.mxu0 %v1682_v13  ;;  %258 = vmatpush.msra.mxu1 %v257_v36  ;;  %v574_v36 = vsub.f32 %v1723_v55, %v2354_v0  ;;  %v580_v0 = vsub.f32 %v1736_v6, %v2356_v60  ;;  %v1804_v60 = vld [vmem:[#allocation2] sm:$0xff] }
  0x2f   :  { %339 = vmatpush.msra.mxu2 %v1700_v39  ;;  %386 = vmatpush.msra.mxu3 %v1682_v13  ;;  %2364 = vst [vmem:[#allocation13_spill] sm:$0xff] %v1804_v60  ;;  %v1827_v61 = vand.u32 4294901760, %v1804_v60 }
  0x30   :  { %175 = vmatpush.msra.mxu0 %v1690_v31  ;;  %264 = vmatpush.msra.mxu1 %v263_v47  ;;  %v281_v47 = vand.u32 4294901760, %v280_v44  ;;  %v575_v41 = vand.u32 4294901760, %v574_v36  ;;  %v2367_v36 = vand.u32 4294901760, %v1769_v35 }
  0x31   :  { %342 = vmatpush.msra.mxu2 %v1715_v53  ;;  %388 = vmatpush.msra.mxu3 %v1690_v31  ;;  %v133_v31 = vld [vmem:[#allocation5 + $0xa8] sm:$0xff]  ;;  %v1851_v23 = vsub.f32 %v1804_v60, %v1827_v61  ;;  %v2375_v60 = vand.u32 4294901760, %v1636_v46  ;;  %v2376_v46 = vand.u32 4294901760, %v1648_v52 }
  0x32   :  { %405 = vmatpush.msrb.mxu0 %v195_v22  ;;  %270 = vmatpush.msra.mxu1 %v269_v62  ;;  %v287_v22 = vand.u32 4294901760, %v286_v2  ;;  %v2365_v62 = vand.u32 4294901760, %v1754_v49  ;;  %v581_v2 = vand.u32 4294901760, %v580_v0 }
  0x33   :  { %345 = vmatpush.msra.mxu2 %v1720_v54  ;;  %570 = vmatpush.msrb.mxu3 %v569_v30  ;;  %v2369_v30 = vand.u32 4294901760, %v1784_v27 }
  0x34   :  { %409 = vmatpush.msrb.mxu0 %v2363_v14  ;;  %276 = vmatpush.msra.mxu1 %v275_v59  ;;  %v586_v44 = vsub.f32 %v1754_v49, %v2365_v62  ;;  %v2366_v14 = vand.u32 4294901760, %v1576_v16  ;;  %v592_v59 = vsub.f32 %v1769_v35, %v2367_v36  ;;  %v2368_v16 = vand.u32 4294901760, %v1581_v19  ;;  %v132_v36 = vld [vmem:[#allocation5 + $0xa0] sm:$0xff] }
  0x35   :  { %517 = vmatpush.msrb.mxu2 %v1676_v8  ;;  %576 = vmatpush.msrb.mxu3 %v575_v41  ;;  %v2370_v62 = vand.u32 4294901760, %v1584_v20  ;;  %v1842_v19 = vand.u32 4294901760, %v133_v31  ;;  %v2371_v41 = vand.u32 4294901760, %v1797_v48  ;;  %v131_v20 = vld [vmem:[#allocation5 + $0x98] sm:$0xff] }
  0x36   :  { %413 = vmatpush.msrb.mxu0 %v2366_v14  ;;  %282 = vmatpush.msra.mxu1 %v281_v47  ;;  %v587_v0 = vand.u32 4294901760, %v586_v44  ;;  %v598_v47 = vsub.f32 %v1784_v27, %v2369_v30  ;;  %v2358_v14 = vand.u32 4294901760, %v1812_v12  ;;  %v2361_v30 = vand.u32 4294901760, %v1837_v37 }
  0x37   :  { %519 = vmatpush.msrb.mxu2 %v1692_v32  ;;  %582 = vmatpush.msrb.mxu3 %v581_v2  ;;  %v604_v44 = vsub.f32 %v1797_v48, %v2371_v41  ;;  %v2373_v41 = vand.u32 4294901760, %v1601_v29  ;;  %v1876_v29 = vld [vmem:[#allocation2 + $0x10] sm:$0xff] }
  0x38   :  { %417 = vmatpush.msrb.mxu0 %v2368_v16  ;;  %288 = vmatpush.msra.mxu1 %v287_v22  ;;  %v593_v22 = vand.u32 4294901760, %v592_v59  ;;  %v2359_v16 = vand.u32 4294901760, %v1824_v57  ;;  %v599_v2 = vand.u32 4294901760, %v598_v47  ;;  %v610_v59 = vsub.f32 %v1812_v12, %v2358_v14 }
  0x39   :  { %521 = vmatpush.msrb.mxu2 %v1707_v43  ;;  %588 = vmatpush.msrb.mxu3 %v587_v0  ;;  %v605_v0 = vand.u32 4294901760, %v604_v44  ;;  %v178_v14 = vand.u32 4294901760, %v1851_v23  ;;  %v622_v44 = vsub.f32 %v1837_v37, %v2361_v30 }
  0x3a   :  { %421 = vmatpush.msrb.mxu0 %v2370_v62  ;;  %476 = vmatpush.msrb.mxu1 %v1555_v3  ;;  %v2372_v62 = vand.u32 4294901760, %v1587_v21  ;;  %v1856_v3 = vand.u32 4294901760, %v132_v36  ;;  %v1867_v21 = vsub.f32 %v133_v31, %v1842_v19  ;;  %v616_v47 = vsub.f32 %v1824_v57, %v2359_v16  ;;  %v129_v16 = vld [vmem:[#allocation5 + $0x88] sm:$0xff] }
  0x3b   :  { %523 = vmatpush.msrb.mxu2 %v1730_v7  ;;  %594 = vmatpush.msrb.mxu3 %v593_v22  ;;  %v611_v22 = vand.u32 4294901760, %v610_v59  ;;  %v179_v59 = vsub.f32 %v1851_v23, %v178_v14 }
  0x3c   :  { %425 = vmatpush.msrb.mxu0 %v2372_v62  ;;  %478 = vmatpush.msrb.mxu1 %v1557_v4  ;;  %v1869_v4 = vand.u32 4294901760, %v131_v20  ;;  %v130_v62 = vld [vmem:[#allocation5 + $0x90] sm:$0xff]  ;;  %v1882_v31 = vsub.f32 %v132_v36, %v1856_v3  ;;  %v1898_v36 = vand.u32 4294901760, %v1876_v29 }
  0x3d   :  { %525 = vmatpush.msrb.mxu2 %v1743_v18  ;;  %600 = vmatpush.msrb.mxu3 %v599_v2  ;;  %v617_v2 = vand.u32 4294901760, %v616_v47 }
  0x3e   :  { %429 = vmatpush.msrb.mxu0 %v2373_v41  ;;  %480 = vmatpush.msrb.mxu1 %v1559_v5  ;;  %v2374_v5 = vand.u32 4294901760, %v1625_v40  ;;  %v1888_v41 = vand.u32 4294901760, %v130_v62  ;;  %v1895_v40 = vsub.f32 %v131_v20, %v1869_v4  ;;  %v623_v20 = vand.u32 4294901760, %v622_v44  ;;  %v1933_v44 = vld [vmem:[#allocation2 + $0x8] sm:$0xff] }
  0x3f   :  { %527 = vmatpush.msrb.mxu2 %v1756_v51  ;;  %606 = vmatpush.msrb.mxu3 %v605_v0  ;;  %v2377_v0 = vand.u32 4294901760, %v1660_v58  ;;  %v185_v47 = vsub.f32 %v1876_v29, %v1898_v36  ;;  %v2378_v58 = vand.u32 4294901760, %v1672_v1 }
  0x40   :  { %433 = vmatpush.msrb.mxu0 %v2374_v5  ;;  %482 = vmatpush.msrb.mxu1 %v1561_v9  ;;  %v627_v9 = vand.u32 4294901760, %v1867_v21  ;;  %v128_v5 = vld [vmem:[#allocation5 + $0x80] sm:$0xff]  ;;  %v1910_v30 = vsub.f32 %v130_v62, %v1888_v41  ;;  %v639_v52 = vand.u32 4294901760, %v1895_v40  ;;  %v180_v62 = vand.u32 4294901760, %v179_v59 }
  0x41   :  { %529 = vmatpush.msrb.mxu2 %v1771_v33  ;;  %612 = vmatpush.msrb.mxu3 %v611_v22  ;;  %v2379_v59 = vand.u32 4294901760, %v1686_v26  ;;  %v2380_v26 = vand.u32 4294901760, %v1700_v39  ;;  %v2381_v39 = vand.u32 4294901760, %v1715_v53 }
  0x42   :  { %437 = vmatpush.msrb.mxu0 %v2375_v60  ;;  %484 = vmatpush.msrb.mxu1 %v1563_v10  ;;  %v633_v10 = vand.u32 4294901760, %v1882_v31  ;;  %v1906_v60 = vand.u32 4294901760, %v129_v16  ;;  %v640_v1 = vsub.f32 %v1895_v40, %v639_v52 }
  0x43   :  { %531 = vmatpush.msrb.mxu2 %v1786_v24  ;;  %618 = vmatpush.msrb.mxu3 %v617_v2  ;;  %v645_v2 = vand.u32 4294901760, %v1910_v30 }
  0x44   :  { %441 = vmatpush.msrb.mxu0 %v2376_v46  ;;  %486 = vmatpush.msrb.mxu1 %v1565_v11  ;;  %v628_v11 = vsub.f32 %v1867_v21, %v627_v9  ;;  %v1921_v46 = vand.u32 4294901760, %v128_v5  ;;  %v1931_v22 = vsub.f32 %v129_v16, %v1906_v60 }
  0x45   :  { %533 = vmatpush.msrb.mxu2 %v1799_v38  ;;  %624 = vmatpush.msrb.mxu3 %v623_v20 }
  0x46   :  { %445 = vmatpush.msrb.mxu0 %v2377_v0  ;;  %488 = vmatpush.msrb.mxu1 %v1578_v17  ;;  %v634_v17 = vsub.f32 %v1882_v31, %v633_v10  ;;  %v186_v0 = vand.u32 4294901760, %v185_v47  ;;  %v1944_v16 = vsub.f32 %v128_v5, %v1921_v46  ;;  %v651_v20 = vand.u32 4294901760, %v1931_v22 }
  0x47   :  { %535 = vmatpush.msrb.mxu2 %v1814_v15  ;;  %181 = vmatmul.f32.vlgmr.msra.gmra.mxu0 %v180_v62  ;;  %v646_v5 = vsub.f32 %v1910_v30, %v645_v2 }
  0x48   :  { %449 = vmatpush.msrb.mxu0 %v2378_v58  ;;  %490 = vmatpush.msrb.mxu1 %v1594_v25  ;;  %v629_v25 = vand.u32 4294901760, %v628_v11  ;;  %v641_v11 = vand.u32 4294901760, %v640_v1  ;;  %v187_v62 = vsub.f32 %v185_v47, %v186_v0  ;;  %v652_v58 = vsub.f32 %v1931_v22, %v651_v20 }
  0x49   :  { %348 = vmatmul.f32.vlgmr.msra.gmra.mxu2 %v1851_v23  ;;  %v1948_v23 = vand.u32 4294901760, %v1933_v44  ;;  %392 = vmatmul.f32.vlgmr.msra.gmra.mxu3 %v178_v14  ;;  %v657_v14 = vand.u32 4294901760, %v1944_v16  ;;  %v647_v53 = vand.u32 4294901760, %v646_v5  ;;  %v2385_v5 = vld [vmem:[#allocation12_spill] sm:$0xff] }
  0x4a   :  { %453 = vmatpush.msrb.mxu0 %v2379_v59  ;;  %492 = vmatpush.msrb.mxu1 %v1598_v28  ;;  %v635_v28 = vand.u32 4294901760, %v634_v17  ;;  %v2382_v17 = vand.u32 4294901760, %v1720_v54 }
  0x4b   :  { %537 = vmatpush.msrb.mxu2 %v1842_v19  ;;  %630 = vmatpush.msrb.mxu3 %v629_v25  ;;  %v658_v59 = vsub.f32 %v1944_v16, %v657_v14  ;;  %v1978_v25 = vld [vmem:[#allocation2 + $0x18] sm:$0xff] }
  0x4c   :  { %457 = vmatpush.msrb.mxu0 %v2380_v26  ;;  %494 = vmatpush.msrb.mxu1 %v1616_v34  ;;  %v1965_v34 = vsub.f32 %v1933_v44, %v1948_v23  ;;  %v1986_v54 = vand.u32 4294901760, %v1978_v25 }
  0x4d   :  { %539 = vmatpush.msrb.mxu2 %v1856_v3  ;;  %290 = vmatmul.f32.vlgmr.msra.gmra.mxu1 %v1827_v61  ;;  %v659_v26 = vand.u32 4294901760, %v658_v59 }
  0x4e   :  { %461 = vmatpush.msrb.mxu0 %v2381_v39  ;;  %496 = vmatpush.msrb.mxu1 %v1633_v45  ;;  %v188_v45 = vand.u32 4294901760, %v187_v62  ;;  %v550_v1 = vand.u32 4294901760, %v1965_v34  ;;  %v905_v62 = vld [vmem:[#allocation7 + $0x48] sm:$0xff] }
  0x4f   :  { %541 = vmatpush.msrb.mxu2 %v1869_v4  ;;  %636 = vmatpush.msrb.mxu3 %v635_v28 }
  0x50   :  { %465 = vmatpush.msrb.mxu0 %v2382_v17  ;;  %498 = vmatpush.msrb.mxu1 %v1644_v50  ;;  %v653_v50 = vand.u32 4294901760, %v652_v58  ;;  %v2142_v58 = vand.u32 4294901760, %v905_v62 }
  0x51   :  { %543 = vmatpush.msrb.mxu2 %v1888_v41  ;;  %642 = vmatpush.msrb.mxu3 %v641_v11  ;;  %v2386_v11 = vand.u32 4294901760, %v1736_v6 }
  0x52   :  { %672 = vmatpush.msra.mxu0 %v1705_v42  ;;  %353 = vmatmul.f32.gmra.mxu2 %v185_v47  ;;  %v2383_v47 = vand.u32 4294901760, %v1705_v42 }
  0x53   :  { %500 = vmatpush.msrb.mxu1 %v1656_v56  ;;  %545 = vmatpush.msrb.mxu2 %v1906_v60  ;;  %v551_v56 = vsub.f32 %v1965_v34, %v550_v1 }
  0x54   :  { %648 = vmatpush.msrb.mxu3 %v647_v53  ;;  %675 = vmatpush.msra.mxu0 %v1723_v55  ;;  %v904_v53 = vld [vmem:[#allocation7 + $0x40] sm:$0xff] }
  0x55   :  { %189 = vmatmul.f32.gmra.mxu0 %v188_v45  ;;  %398 = vmatmul.f32.gmra.mxu3 %v186_v0  ;;  %v1999_v0 = vsub.f32 %v1978_v25, %v1986_v54  ;;  %v552_v28 = vand.u32 4294901760, %v551_v56 }
  0x56   :  { %502 = vmatpush.msrb.mxu1 %v1668_v63  ;;  %547 = vmatpush.msrb.mxu2 %v1921_v46  ;;  %v2384_v63 = vand.u32 4294901760, %v1723_v55  ;;  %v2388_v55 = vand.u32 4294901760, %v1769_v35 }
  0x57   :  { %654 = vmatpush.msrb.mxu3 %v653_v50  ;;  %678 = vmatpush.msra.mxu0 %v1736_v6  ;;  %v558_v42 = vand.u32 4294901760, %v1999_v0  ;;  %v73_v6 = vand.u32 2147483647, %v1933_v44 }
  0x58   :  { %777 = vmatpush.msra.mxu2 %v2383_v47  ;;  %294 = vmatmul.f32.gmra.mxu1 %v1898_v36 }
  0x59   :  { %504 = vmatpush.msrb.mxu1 %v1682_v13  ;;  %660 = vmatpush.msrb.mxu3 %v659_v26  ;;  %v2387_v13 = vand.u32 4294901760, %v1754_v49 }
  0x5a   :  { %681 = vmatpush.msra.mxu0 %v1754_v49  ;;  %781 = vmatpush.msra.mxu2 %v2384_v63  ;;  %v2389_v49 = vand.u32 4294901760, %v1784_v27 }
  0x5b   :  { %848 = vmatpush.msra.mxu3 %v1676_v8  ;;  %506 = vmatpush.msrb.mxu1 %v2385_v5 }
  0x5c   :  { %684 = vmatpush.msra.mxu0 %v1769_v35  ;;  %785 = vmatpush.msra.mxu2 %v2386_v11  ;;  %v2390_v35 = vand.u32 4294901760, %v1797_v48 }
  0x5d   :  { %730 = vmatpush.msra.mxu1 %v1676_v8  ;;  %850 = vmatpush.msra.mxu3 %v1692_v32  ;;  %v559_v8 = vsub.f32 %v1999_v0, %v558_v42 }
  0x5e   :  { %553 = vmatmul.f32.vlgmr.msrb.gmra.mxu2 %v552_v28  ;;  %687 = vmatpush.msra.mxu0 %v1784_v27  ;;  %v2392_v27 = vand.u32 4294901760, %v1812_v12  ;;  %v902_v28 = vld [vmem:[#allocation7 + $0x30] sm:$0xff] }
  0x5f   :  { %732 = vmatpush.msra.mxu1 %v1692_v32  ;;  %789 = vmatpush.msra.mxu2 %v2387_v13  ;;  %v560_v32 = vand.u32 4294901760, %v559_v8  ;;  %v2168_v8 = vand.u32 4294901760, %v902_v28 }
  0x60   :  { %852 = vmatpush.msra.mxu3 %v1707_v43  ;;  %467 = vmatmul.f32.vlgmr.msrb.gmra.mxu0 %v1827_v61 }
  0x61   :  { %662 = vmatmul.f32.vlgmr.msrb.gmra.mxu3 %v1948_v23  ;;  %690 = vmatpush.msra.mxu0 %v1797_v48 }
  0x62   :  { %734 = vmatpush.msra.mxu1 %v1707_v43  ;;  %793 = vmatpush.msra.mxu2 %v2388_v55  ;;  %v2391_v43 = vld [vmem:[#allocation13_spill] sm:$0xff]  ;;  %v901_v55 = vld [vmem:[#allocation7 + $0x28] sm:$0xff] }
  0x63   :  { %854 = vmatpush.msra.mxu3 %v1730_v7  ;;  %508 = vmatmul.f32.vlgmr.msrb.gmra.mxu1 %v1827_v61 }
  0x64   :  { %693 = vmatpush.msra.mxu0 %v1812_v12  ;;  %736 = vmatpush.msra.mxu1 %v1730_v7  ;;  %v72_v7 = vand.u32 2147483647, %v2391_v43  ;;  %v75_v12 = vand.u32 2147483647, %v1978_v25  ;;  %v1002_v25 = vsub.f32 %v905_v62, %v2142_v58  ;;  %v2173_v43 = vand.u32 4294901760, %v901_v55  ;;  %v896_v62 = vld [vmem:[#allocation7] sm:$0xff] }
  0x65   :  { %797 = vmatpush.msra.mxu2 %v2389_v49  ;;  %856 = vmatpush.msra.mxu3 %v1743_v18 }
  0x66   :  { %696 = vmatpush.msra.mxu0 %v1824_v57  ;;  %738 = vmatpush.msra.mxu1 %v1743_v18  ;;  %v2393_v18 = vand.u32 4294901760, %v1824_v57  ;;  %v76_v48 = vadd.f32 %v73_v6, %v72_v7  ;;  %v2156_v56 = vand.u32 4294901760, %v1002_v25  ;;  %v1020_v7 = vsub.f32 %v902_v28, %v2168_v8  ;;  %v900_v6 = vld [vmem:[#allocation7 + $0x20] sm:$0xff] }
  0x67   :  { %801 = vmatpush.msra.mxu2 %v2390_v35  ;;  %858 = vmatpush.msra.mxu3 %v1756_v51 }
  0x68   :  { %561 = vmatmul.f32.gmra.mxu2 %v560_v32  ;;  %699 = vmatpush.msra.mxu0 %v1837_v37 }
  0x69   :  { %740 = vmatpush.msra.mxu1 %v1756_v51  ;;  %805 = vmatpush.msra.mxu2 %v2392_v27  ;;  %v2394_v51 = vand.u32 4294901760, %v1837_v37 }
  0x6a   :  { %860 = vmatpush.msra.mxu3 %v1771_v33  ;;  %471 = vmatmul.f32.gmra.mxu0 %v1898_v36 }
  0x6b   :  { %666 = vmatmul.f32.gmra.mxu3 %v1986_v54  ;;  %702 = vmatpush.msra.mxu0 %v1867_v21 }
  0x6c   :  { %742 = vmatpush.msra.mxu1 %v1771_v33  ;;  %809 = vmatpush.msra.mxu2 %v2393_v18  ;;  %v74_v33 = vand.u32 2147483647, %v1876_v29 }
  0x6d   :  { %862 = vmatpush.msra.mxu3 %v1786_v24  ;;  %512 = vmatmul.f32.gmra.mxu1 %v1898_v36 }
  0x6e   :  { %705 = vmatpush.msra.mxu0 %v1882_v31  ;;  %744 = vmatpush.msra.mxu1 %v1786_v24  ;;  %v79_v24 = vadd.f32 %v75_v12, %v74_v33  ;;  %v2184_v33 = vand.u32 4294901760, %v1020_v7  ;;  %v899_v12 = vld [vmem:[#allocation7 + $0x18] sm:$0xff] }
  0x6f   :  { %813 = vmatpush.msra.mxu2 %v2394_v51  ;;  %864 = vmatpush.msra.mxu3 %v1799_v38  ;;  %v2180_v51 = vand.u32 4294901760, %v900_v6 }
  0x70   :  { %77 = vadd.xlane.f32.xlu0 %v76_v48  ;;  %708 = vmatpush.msra.mxu0 %v1895_v40  ;;  %v907_v40 = vld [vmem:[#allocation7 + $0x58] sm:$0xff]  ;;  %v1026_v48 = vsub.f32 %v901_v55, %v2173_v43 }
  0x71   :  { %746 = vmatpush.msra.mxu1 %v1799_v38  ;;  %817 = vmatpush.msra.mxu2 %v627_v9  ;;  %v911_v38 = vld [vmem:[#allocation7 + $0x78] sm:$0xff] }
  0x72   :  { %866 = vmatpush.msra.mxu3 %v1814_v15  ;;  %711 = vmatpush.msra.mxu0 %v1910_v30  ;;  %v2102_v57 = vand.u32 4294901760, %v911_v38 }
  0x73   :  { %748 = vmatpush.msra.mxu1 %v1814_v15  ;;  %821 = vmatpush.msra.mxu2 %v633_v10  ;;  %v910_v15 = vld [vmem:[#allocation7 + $0x70] sm:$0xff] }
  0x74   :  { %868 = vmatpush.msra.mxu3 %v1842_v19  ;;  %714 = vmatpush.msra.mxu0 %v1931_v22  ;;  %v966_v61 = vsub.f32 %v911_v38, %v2102_v57  ;;  %v2105_v37 = vand.u32 4294901760, %v910_v15  ;;  %v906_v22 = vld [vmem:[#allocation7 + $0x50] sm:$0xff]  ;;  %v2186_v38 = vand.u32 4294901760, %v1026_v48 }
  0x75   :  { %750 = vmatpush.msra.mxu1 %v1842_v19  ;;  %825 = vmatpush.msra.mxu2 %v639_v52  ;;  %v909_v19 = vld [vmem:[#allocation7 + $0x68] sm:$0xff] }
  0x76   :  { %870 = vmatpush.msra.mxu3 %v1856_v3  ;;  %717 = vmatpush.msra.mxu0 %v1944_v16  ;;  %v972_v30 = vsub.f32 %v910_v15, %v2105_v37  ;;  %v2112_v21 = vand.u32 4294901760, %v909_v19  ;;  %v1032_v15 = vsub.f32 %v900_v6, %v2180_v51 }
  0x77   :  { %752 = vmatpush.msra.mxu1 %v1856_v3  ;;  %829 = vmatpush.msra.mxu2 %v645_v2  ;;  %v2109_v3 = vand.u32 4294901760, %v966_v61 }
  0x78   :  { %872 = vmatpush.msra.mxu3 %v1869_v4  ;;  %720 = vmatmul.f32.vlgmr.msra.gmra.mxu0 %v1965_v34  ;;  %v2117_v31 = vand.u32 4294901760, %v972_v30 }
  0x79   :  { %80 = vadd.xlane.f32.xlu0 %v79_v24  ;;  %754 = vmatpush.msra.mxu1 %v1869_v4  ;;  %v908_v4 = vld [vmem:[#allocation7 + $0x60] sm:$0xff]  ;;  %v968_v29 = vsub.f32 %v966_v61, %v2109_v3 }
  0x7a   :  { %833 = vmatpush.msra.mxu2 %v651_v20  ;;  %874 = vmatpush.msra.mxu3 %v1888_v41  ;;  %v2120_v9 = vand.u32 4294901760, %v908_v4  ;;  %v974_v10 = vsub.f32 %v972_v30, %v2117_v31 }
  0x7b   :  { %756 = vmatpush.msra.mxu1 %v1888_v41  ;;  %917 = vmatpush.msrb.mxu0 %v2102_v57  ;;  %v978_v41 = vsub.f32 %v909_v19, %v2112_v21  ;;  %v969_v36 = vand.u32 4294901760, %v968_v29  ;;  %v2192_v19 = vand.u32 4294901760, %v899_v12  ;;  %v2195_v29 = vand.u32 4294901760, %v1032_v15 }
  0x7c   :  { %837 = vmatpush.msra.mxu2 %v657_v14  ;;  %876 = vmatpush.msra.mxu3 %v1906_v60  ;;  %v984_v52 = vsub.f32 %v908_v4, %v2120_v9  ;;  %v975_v44 = vand.u32 4294901760, %v974_v10  ;;  %v1028_v4 = vsub.f32 %v1026_v48, %v2186_v38  ;;  %v897_v10 = vld [vmem:[#allocation7 + $0x8] sm:$0xff] }
  0x7d   :  { %839 = vmatmul.f32.vlgmr.msra.gmra.mxu2 %v1948_v23  ;;  %758 = vmatpush.msra.mxu1 %v1906_v60  ;;  %v2125_v60 = vand.u32 4294901760, %v978_v41 }
  0x7e   :  { %878 = vmatpush.msra.mxu3 %v1921_v46  ;;  %1072 = vmatpush.msrb.mxu2 %v966_v61  ;;  %v2133_v16 = vand.u32 4294901760, %v984_v52  ;;  %v1022_v61 = vsub.f32 %v1020_v7, %v2184_v33 }
  0x7f   :  { %880 = vmatmul.f32.vlgmr.msra.gmra.mxu3 %v1948_v23  ;;  %760 = vmatpush.msra.mxu1 %v1921_v46  ;;  %v2129_v46 = vand.u32 4294901760, %v907_v40  ;;  %v980_v2 = vsub.f32 %v978_v41, %v2125_v60  ;;  %v2135_v23 = vand.u32 4294901760, %v906_v22 }
  0x80   :  { %725 = vmatmul.f32.gmra.mxu0 %v1999_v0  ;;  %764 = vmatmul.f32.vlgmr.msra.gmra.mxu1 %v550_v1  ;;  %v986_v39 = vsub.f32 %v984_v52, %v2133_v16  ;;  %v2150_v1 = vand.u32 4294901760, %v904_v53 }
  0x81   :  { %1130 = vmatpush.msrb.mxu3 %v2102_v57  ;;  %919 = vmatpush.msrb.mxu0 %v2105_v37  ;;  %v990_v20 = vsub.f32 %v907_v40, %v2129_v46  ;;  %v981_v14 = vand.u32 4294901760, %v980_v2  ;;  %v996_v34 = vsub.f32 %v906_v22, %v2135_v23  ;;  %v1023_v40 = vand.u32 4294901760, %v1022_v61 }
  0x82   :  { %1075 = vmatpush.msrb.mxu2 %v972_v30  ;;  %970 = vmatpush.msrb.mxu1 %v969_v36  ;;  %v987_v45 = vand.u32 4294901760, %v986_v39  ;;  %v1008_v47 = vsub.f32 %v904_v53, %v2150_v1  ;;  %v898_v30 = vld [vmem:[#allocation7 + $0x10] sm:$0xff]  ;;  %v1038_v36 = vsub.f32 %v899_v12, %v2192_v19  ;;  %v1034_v22 = vsub.f32 %v1032_v15, %v2195_v29 }
  0x83   :  { %1132 = vmatpush.msrb.mxu3 %v2105_v37  ;;  %921 = vmatpush.msrb.mxu0 %v2112_v21  ;;  %v2144_v17 = vand.u32 4294901760, %v990_v20  ;;  %v2147_v59 = vand.u32 4294901760, %v996_v34  ;;  %v2212_v53 = vand.u32 4294901760, %v896_v62 }
  0x84   :  { %1078 = vmatpush.msrb.mxu2 %v978_v41  ;;  %976 = vmatpush.msrb.mxu1 %v975_v44  ;;  %v2164_v11 = vand.u32 4294901760, %v1008_v47  ;;  %v2197_v41 = vand.u32 4294901760, %v898_v30  ;;  %v2206_v2 = vand.u32 4294901760, %v1038_v36  ;;  %v1035_v39 = vand.u32 4294901760, %v1034_v22 }
  0x85   :  { %843 = vmatmul.f32.gmra.mxu2 %v1986_v54  ;;  %1134 = vmatpush.msrb.mxu3 %v2112_v21  ;;  %v992_v50 = vsub.f32 %v990_v20, %v2144_v17  ;;  %v998_v26 = vsub.f32 %v996_v34, %v2147_v59 }
  0x86   :  { %923 = vmatpush.msrb.mxu0 %v2120_v9  ;;  %1081 = vmatpush.msrb.mxu2 %v984_v52  ;;  %v1010_v49 = vsub.f32 %v1008_v47, %v2164_v11  ;;  %v1029_v52 = vand.u32 4294901760, %v1028_v4  ;;  %v1044_v44 = vsub.f32 %v898_v30, %v2197_v41 }
  0x87   :  { %884 = vmatmul.f32.gmra.mxu3 %v1986_v54  ;;  %982 = vmatpush.msrb.mxu1 %v981_v14  ;;  %v903_v54 = vld [vmem:[#allocation7 + $0x38] sm:$0xff]  ;;  %v993_v63 = vand.u32 4294901760, %v992_v50  ;;  %v999_v5 = vand.u32 4294901760, %v998_v26 }
  0x88   :  { %770 = vmatmul.f32.gmra.mxu1 %v558_v42  ;;  %1136 = vmatpush.msrb.mxu3 %v2120_v9  ;;  %v2159_v0 = vand.u32 4294901760, %v903_v54  ;;  %v1004_v42 = vsub.f32 %v1002_v25, %v2156_v56  ;;  %v1011_v27 = vand.u32 4294901760, %v1010_v49 }
  0x89   :  { %925 = vmatpush.msrb.mxu0 %v2129_v46  ;;  %1084 = vmatpush.msrb.mxu2 %v990_v20  ;;  %v2208_v20 = vand.u32 4294901760, %v897_v10 }
  0x8a   :  { %1138 = vmatpush.msrb.mxu3 %v2129_v46  ;;  %988 = vmatpush.msrb.mxu1 %v987_v45  ;;  %v1014_v13 = vsub.f32 %v903_v54, %v2159_v0  ;;  %v1005_v32 = vand.u32 4294901760, %v1004_v42  ;;  %v1040_v45 = vsub.f32 %v1038_v36, %v2206_v2  ;;  %v1056_v54 = vsub.f32 %v896_v62, %v2212_v53 }
  0x8b   :  { %927 = vmatpush.msrb.mxu0 %v2135_v23  ;;  %1087 = vmatpush.msrb.mxu2 %v996_v34  ;;  %v2210_v34 = vand.u32 4294901760, %v1044_v44 }
  0x8c   :  { %1140 = vmatpush.msrb.mxu3 %v2135_v23  ;;  %994 = vmatpush.msrb.mxu1 %v993_v63  ;;  %v2171_v35 = vand.u32 4294901760, %v1014_v13  ;;  %v1041_v26 = vand.u32 4294901760, %v1040_v45  ;;  %v2224_v28 = vand.u32 4294901760, %v1056_v54 }
  0x8d   :  { %929 = vmatpush.msrb.mxu0 %v2142_v58  ;;  %1090 = vmatpush.msrb.mxu2 %v1002_v25  ;;  %v1050_v25 = vsub.f32 %v897_v10, %v2208_v20  ;;  %v1046_v50 = vsub.f32 %v1044_v44, %v2210_v34 }
  0x8e   :  { %1142 = vmatpush.msrb.mxu3 %v2142_v58  ;;  %1000 = vmatpush.msrb.mxu1 %v999_v5  ;;  %v1016_v18 = vsub.f32 %v1014_v13, %v2171_v35 }
  0x8f   :  { %931 = vmatpush.msrb.mxu0 %v2150_v1  ;;  %1093 = vmatpush.msrb.mxu2 %v1008_v47  ;;  %v2222_v47 = vand.u32 4294901760, %v1050_v25  ;;  %v1047_v63 = vand.u32 4294901760, %v1046_v50 }
  0x90   :  { %1144 = vmatpush.msrb.mxu3 %v2150_v1  ;;  %1006 = vmatpush.msrb.mxu1 %v1005_v32  ;;  %v1017_v24 = vand.u32 4294901760, %v1016_v18 }
  0x91   :  { %933 = vmatpush.msrb.mxu0 %v2159_v0  ;;  %1096 = vmatpush.msrb.mxu2 %v1014_v13  ;;  %v1052_v5 = vsub.f32 %v1050_v25, %v2222_v47  ;;  %v1058_v13 = vsub.f32 %v1056_v54, %v2224_v28 }
  0x92   :  { %1146 = vmatpush.msrb.mxu3 %v2159_v0  ;;  %1012 = vmatpush.msrb.mxu1 %v1011_v27 }
  0x93   :  { %935 = vmatpush.msrb.mxu0 %v2168_v8  ;;  %1099 = vmatpush.msrb.mxu2 %v1020_v7  ;;  %v1053_v55 = vand.u32 4294901760, %v1052_v5  ;;  %v1059_v32 = vand.u32 4294901760, %v1058_v13 }
  0x94   :  { %1148 = vmatpush.msrb.mxu3 %v2168_v8  ;;  %1018 = vmatpush.msrb.mxu1 %v1017_v24 }
  0x95   :  { %937 = vmatpush.msrb.mxu0 %v2173_v43  ;;  %1102 = vmatpush.msrb.mxu2 %v1026_v48 }
  0x96   :  { %1150 = vmatpush.msrb.mxu3 %v2173_v43  ;;  %1024 = vmatpush.msrb.mxu1 %v1023_v40 }
  0x97   :  { %939 = vmatpush.msrb.mxu0 %v2180_v51  ;;  %1105 = vmatpush.msrb.mxu2 %v1032_v15 }
  0x98   :  { %1152 = vmatpush.msrb.mxu3 %v2180_v51  ;;  %1030 = vmatpush.msrb.mxu1 %v1029_v52 }
  0x99   :  { %941 = vmatpush.msrb.mxu0 %v2192_v19  ;;  %1108 = vmatpush.msrb.mxu2 %v1038_v36 }
  0x9a   :  { %1154 = vmatpush.msrb.mxu3 %v2192_v19  ;;  %1036 = vmatpush.msrb.mxu1 %v1035_v39 }
  0x9b   :  { %943 = vmatpush.msrb.mxu0 %v2197_v41  ;;  %1111 = vmatpush.msrb.mxu2 %v1044_v44 }
  0x9c   :  { %1156 = vmatpush.msrb.mxu3 %v2197_v41  ;;  %1042 = vmatpush.msrb.mxu1 %v1041_v26  ;;  %v1390_v26 = vld [vmem:[%s2335_s2] ss:$0 sm:$0xff] }
  0x9d   :  { %945 = vmatpush.msrb.mxu0 %v2208_v20  ;;  %1114 = vmatpush.msrb.mxu2 %v1050_v25 }
  0x9e   :  { %1158 = vmatpush.msrb.mxu3 %v2208_v20  ;;  %1048 = vmatpush.msrb.mxu1 %v1047_v63 }
  0x9f   :  { %947 = vmatpush.msrb.mxu0 %v2212_v53  ;;  %1117 = vmatpush.msrb.mxu2 %v1056_v54 }
  0xa0   :  { %1160 = vmatpush.msrb.mxu3 %v2212_v53  ;;  %1054 = vmatpush.msrb.mxu1 %v1053_v55 }
  0xa1   :  { %1350 = vmatpush.msra.mxu2 %v2109_v3  ;;  %1177 = vmatpush.msra.mxu0 %v2109_v3 }
  0xa2   :  { %1366 = vmatpush.msra.mxu3 %v2102_v57  ;;  %1060 = vmatpush.msrb.mxu1 %v1059_v32 }
  0xa3   :  { %1351 = vmatpush.msra.mxu2 %v2117_v31  ;;  %1181 = vmatpush.msra.mxu0 %v2117_v31 }
  0xa4   :  { %1367 = vmatpush.msra.mxu3 %v2105_v37  ;;  %1248 = vmatpush.msra.mxu1 %v2102_v57 }
  0xa5   :  { %1352 = vmatpush.msra.mxu2 %v2125_v60  ;;  %1185 = vmatpush.msra.mxu0 %v2125_v60 }
  0xa6   :  { %1368 = vmatpush.msra.mxu3 %v2112_v21  ;;  %1250 = vmatpush.msra.mxu1 %v2105_v37 }
  0xa7   :  { %1353 = vmatpush.msra.mxu2 %v2133_v16  ;;  %1189 = vmatpush.msra.mxu0 %v2133_v16 }
  0xa8   :  { %1369 = vmatpush.msra.mxu3 %v2120_v9  ;;  %1252 = vmatpush.msra.mxu1 %v2112_v21 }
  0xa9   :  { %1354 = vmatpush.msra.mxu2 %v2144_v17  ;;  %1193 = vmatpush.msra.mxu0 %v2144_v17 }
  0xaa   :  { %1370 = vmatpush.msra.mxu3 %v2129_v46  ;;  %1254 = vmatpush.msra.mxu1 %v2120_v9 }
  0xab   :  { %1355 = vmatpush.msra.mxu2 %v2147_v59  ;;  %1197 = vmatpush.msra.mxu0 %v2147_v59 }
  0xac   :  { %1371 = vmatpush.msra.mxu3 %v2135_v23  ;;  %1256 = vmatpush.msra.mxu1 %v2129_v46 }
  0xad   :  { %1356 = vmatpush.msra.mxu2 %v2156_v56  ;;  %1201 = vmatpush.msra.mxu0 %v2156_v56 }
  0xae   :  { %1372 = vmatpush.msra.mxu3 %v2142_v58  ;;  %1258 = vmatpush.msra.mxu1 %v2135_v23 }
  0xaf   :  { %1357 = vmatpush.msra.mxu2 %v2164_v11  ;;  %1205 = vmatpush.msra.mxu0 %v2164_v11 }
  0xb0   :  { %1373 = vmatpush.msra.mxu3 %v2150_v1  ;;  %1260 = vmatpush.msra.mxu1 %v2142_v58 }
  0xb1   :  { %1358 = vmatpush.msra.mxu2 %v2171_v35  ;;  %1209 = vmatpush.msra.mxu0 %v2171_v35 }
  0xb2   :  { %1374 = vmatpush.msra.mxu3 %v2159_v0  ;;  %1262 = vmatpush.msra.mxu1 %v2150_v1 }
  0xb3   :  { %1359 = vmatpush.msra.mxu2 %v2184_v33  ;;  %1213 = vmatpush.msra.mxu0 %v2184_v33 }
  0xb4   :  { %1375 = vmatpush.msra.mxu3 %v2168_v8  ;;  %1264 = vmatpush.msra.mxu1 %v2159_v0 }
  0xb5   :  { %1360 = vmatpush.msra.mxu2 %v2186_v38  ;;  %1217 = vmatpush.msra.mxu0 %v2186_v38 }
  0xb6   :  { %1376 = vmatpush.msra.mxu3 %v2173_v43  ;;  %1266 = vmatpush.msra.mxu1 %v2168_v8 }
  0xb7   :  { %1361 = vmatpush.msra.mxu2 %v2195_v29  ;;  %1221 = vmatpush.msra.mxu0 %v2195_v29 }
  0xb8   :  { %1377 = vmatpush.msra.mxu3 %v2180_v51  ;;  %1268 = vmatpush.msra.mxu1 %v2173_v43 }
  0xb9   :  { %1362 = vmatpush.msra.mxu2 %v2206_v2  ;;  %1225 = vmatpush.msra.mxu0 %v2206_v2 }
  0xba   :  { %1378 = vmatpush.msra.mxu3 %v2192_v19  ;;  %1270 = vmatpush.msra.mxu1 %v2180_v51 }
  0xbb   :  { %1363 = vmatpush.msra.mxu2 %v2210_v34  ;;  %1229 = vmatpush.msra.mxu0 %v2210_v34 }
  0xbc   :  { %1379 = vmatpush.msra.mxu3 %v2197_v41  ;;  %1272 = vmatpush.msra.mxu1 %v2192_v19 }
  0xbd   :  { %1364 = vmatpush.msra.mxu2 %v2222_v47  ;;  %1233 = vmatpush.msra.mxu0 %v2222_v47 }
  0xbe   :  { %1380 = vmatpush.msra.mxu3 %v2208_v20  ;;  %1274 = vmatpush.msra.mxu1 %v2197_v41 }
  0xbf   :  { %1365 = vmatpush.msra.mxu2 %v2224_v28  ;;  %1237 = vmatpush.msra.mxu0 %v2224_v28 }
  0xc0   :  { %1381 = vmatpush.msra.mxu3 %v2212_v53  ;;  %1276 = vmatpush.msra.mxu1 %v2208_v20 }
  0xc2   :  { %1278 = vmatpush.msra.mxu1 %v2212_v53 }
  0xc4   :  { %v182_v14 = vpop.f32.mrf.mxu0 }
  0xca   :  { %v291_v42 = vpop.f32.mrf.mxu1 }
  0xcb   :  { %v292_v57 = vadd.f32 %v291_v42, %v182_v14 }
  0xcc   :  { %v349_v49 = vpop.f32.mrf.mxu2  ;;  %v393_v6 = vpop.f32.mrf.mxu3 }
  0xcd   :  { %v350_v16 = vadd.f32 %v349_v49, %v292_v57 }
  0xcf   :  { %v394_v9 = vadd.f32 %v393_v6, %v350_v16 }
  0xd2   :  { %v190_v7 = vpop.f32.mrf.mxu0 }
  0xd5   :  { %v295_v3 = vpop.f32.mrf.mxu1  ;;  %v354_v37 = vpop.f32.mrf.mxu2 }
  0xd6   :  { %v296_v46 = vadd.f32 %v295_v3, %v190_v7 }
  0xd8   :  { %v399_v17 = vpop.f32.mrf.mxu3  ;;  %v355_v11 = vadd.f32 %v354_v37, %v296_v46 }
  0xda   :  { %v400_v48 = vadd.f32 %v399_v17, %v355_v11 }
  0xdd   :  { %v468_v21 = vpop.f32.mrf.mxu0 }
  0xde   :  { %v469_v35 = vadd.f32 %v468_v21, %v394_v9 }
  0xe0   :  { %v509_v59 = vpop.f32.mrf.mxu1 }
  0xe1   :  { %v554_v27 = vpop.f32.mrf.mxu2  ;;  %v510_v33 = vadd.f32 %v509_v59, %v469_v35 }
  0xe3   :  { %v78_v31 = vpop.xlane.xlu0 %77  ;;  %v555_v24 = vadd.f32 %v554_v27, %v510_v33 }
  0xe4   :  { %v2253_v60 = vadd.f32 1e-08, %v78_v31  ;;  %v663_v18 = vpop.f32.mrf.mxu3 }
  0xe5   :  { %v664_v19 = vadd.f32 %v663_v18, %v555_v24  ;;  %v1391_v18 = vld [vmem:[%s2337_s4] ss:$0 sm:$0xff]  ;;  %s1509_s4 = smov [#allocation8]  }
  0xe6   :  { %1392 = vrcp.f32 %v2253_v60  ;;  %vm89_vm0 = vweird.f32 %v2253_v60  ;;  %v95_v36 = vand.u32 2147483648, %v2253_v60  ;;  %v93_v22 = vand.u32 2147483647, %v2253_v60  ;;  %s1334_s12 = sshll.u32 %s1509_s4, 4  ;;  %s1335_s12 = int_to_ptr.vmem [resolvable:$true] %s1334_s12 }
  0xe7   :  { %v472_v1 = vpop.f32.mrf.mxu0 }
  0xe8   :  { %v473_v38 = vadd.f32 %v472_v1, %v400_v48  ;;  %v96_v14 = vor.u32 1.1754944e-38, %v95_v36  ;;  %vm94_vm3 = vcmp.eq.f32.partialorder %v93_v22, 8.507059e+37 }
  0xea   :  { %v513_v12 = vpop.f32.mrf.mxu1 }
  0xeb   :  { %v562_v15 = vpop.f32.mrf.mxu2  ;;  %v514_v4 = vadd.f32 %v513_v12, %v473_v38 }
  0xec   :  { %v81_v23 = vpop.xlane.xlu0 %80  ;;  %v2278_v58 = vpop.eup %1392 }
  0xed   :  { %v2274_v56 = vadd.f32 1e-08, %v81_v23  ;;  %v85_v0 = vmul.f32 %v2278_v58, %v2253_v60  ;;  %vm90_vm1 = vweird.f32 %v2278_v58  ;;  %v563_v44 = vadd.f32 %v562_v15, %v514_v4 }
  0xee   :  { %v667_v29 = vpop.f32.mrf.mxu3  ;;  %vm2311_vm2 = vmor %vm89_vm0, %vm90_vm1 }
  0xef   :  { %1394 = vrcp.f32 %v2274_v56  ;;  %v86_v8 = vsub.f32 1.0, %v85_v0  ;;  %v668_v25 = vadd.f32 %v667_v29, %v563_v44  ;;  %vm103_vm4 = vweird.f32 %v2274_v56 }
  0xf0   :  { %v109_v28 = vand.u32 2147483648, %v2274_v56  ;;  %v107_v55 = vand.u32 2147483647, %v2274_v56 }
  0xf1   :  { %v87_v30 = vmul.f32 %v2278_v58, %v86_v8 }
  0xf2   :  { %v110_v6 = vor.u32 1.1754944e-38, %v109_v28  ;;  %vm108_vm7 = vcmp.eq.f32.partialorder %v107_v55, 8.507059e+37 }
  0xf3   :  { %v88_v52 = vadd.f32 %v2278_v58, %v87_v30 }
  0xf5   :  { %v1395_v43 = vpop.eup %1394  ;;  %v721_v51 = vpop.f32.mrf.mxu0  ;;  %v92_v53 = vsel %vm2311_vm2, %v2278_v58, %v88_v52 }
  0xf6   :  { %v99_v61 = vmul.f32 %v1395_v43, %v2274_v56  ;;  %v722_v40 = vadd.f32 %v721_v51, %v664_v19  ;;  %vm104_vm5 = vweird.f32 %v1395_v43  ;;  %v97_v63 = vsel %vm94_vm3, %v96_v14, %v92_v53 }
  0xf7   :  { %vm105_vm6 = vmor %vm103_vm4, %vm104_vm5 }
  0xf8   :  { %v100_v41 = vsub.f32 1.0, %v99_v61 }
  0xfa   :  { %v101_v45 = vmul.f32 %v1395_v43, %v100_v41 }
  0xfc   :  { %v102_v13 = vadd.f32 %v1395_v43, %v101_v45 }
  0xfd   :  { %v765_v10 = vpop.f32.mrf.mxu1  ;;  %v726_v39 = vpop.f32.mrf.mxu0 }
  0xfe   :  { %v766_v2 = vadd.f32 %v765_v10, %v722_v40  ;;  %v727_v47 = vadd.f32 %v726_v39, %v668_v25  ;;  %v106_v31 = vsel %vm105_vm6, %v1395_v43, %v102_v13 }
  0xff   :  { %v111_v16 = vsel %vm108_vm7, %v110_v6, %v106_v31 }
 0x100   :  { %v840_v62 = vpop.f32.mrf.mxu2 }
 0x101   :  { %v841_v34 = vadd.f32 %v840_v62, %v766_v2 }
 0x102   :  { %v881_v50 = vpop.f32.mrf.mxu3 }
 0x103   :  { %v882_v54 = vadd.f32 %v881_v50, %v841_v34 }
 0x105   :  { %v888_v5 = vmul.f32 %v882_v54, %v97_v63  ;;  %v771_v42 = vpop.f32.mrf.mxu1 }
 0x106   :  { %v772_v32 = vadd.f32 %v771_v42, %v727_v47 }
 0x107   :  { %v894_v49 = vadd.f32 %v1390_v26, %v888_v5 }
 0x108   :  { %v844_v7 = vpop.f32.mrf.mxu2 }
 0x109   :  { %v948_v3 = vand.u32 4294901760, %v894_v49  ;;  %v845_v57 = vadd.f32 %v844_v7, %v772_v32 }
 0x10a   :  { %v885_v37 = vpop.f32.mrf.mxu3 }
 0x10b   :  { %v949_v60 = vsub.f32 %v894_v49, %v948_v3  ;;  %v886_v21 = vadd.f32 %v885_v37, %v845_v57  ;;  %1062 = vmatmul.f32.vlgmr.msrb.gmra.mxu1 %v948_v3 }
 0x10d   :  { %v889_v17 = vmul.f32 %v886_v21, %v111_v16  ;;  %1120 = vmatmul.f32.vlgmr.msrb.gmra.mxu2 %v949_v60  ;;  %v950_v9 = vand.u32 4294901760, %v949_v60 }
 0x10f   :  { %v895_v46 = vadd.f32 %v1390_v26, %v889_v17  ;;  %1164 = vmatmul.f32.vlgmr.msrb.gmra.mxu3 %v950_v9  ;;  %v951_v59 = vsub.f32 %v949_v60, %v950_v9 }
 0x111   :  { %v956_v23 = vand.u32 4294901760, %v895_v46  ;;  %v952_v56 = vand.u32 4294901760, %v951_v59 }
 0x113   :  { %953 = vmatmul.f32.vlgmr.msrb.gmra.mxu0 %v952_v56  ;;  %1066 = vmatmul.f32.gmra.mxu1 %v956_v23  ;;  %v957_v58 = vsub.f32 %v895_v46, %v956_v23 }
 0x115   :  { %1125 = vmatmul.f32.gmra.mxu2 %v957_v58  ;;  %v958_v11 = vand.u32 4294901760, %v957_v58 }
 0x117   :  { %1170 = vmatmul.f32.gmra.mxu3 %v958_v11  ;;  %v959_v35 = vsub.f32 %v957_v58, %v958_v11 }
 0x119   :  { %v960_v27 = vand.u32 4294901760, %v959_v35 }
 0x11b   :  { %961 = vmatmul.f32.gmra.mxu0 %v960_v27  ;;  %1280 = vmatmul.f32.vlgmr.msra.gmra.mxu1 %v948_v3 }
 0x11d   :  { %1243 = vmatmul.f32.vlgmr.msra.gmra.mxu2 %v956_v23 }
 0x11f   :  { %1284 = vmatmul.f32.vlgmr.msra.gmra.mxu3 %v956_v23 }
 0x123   :  { %1239 = vmatmul.f32.vlgmr.msra.gmra.mxu0 %v948_v3 }
 0x188   :  { %v1063_v1 = vpop.f32.mrf.mxu1 }
 0x190   :  { %v954_v0 = vpop.f32.mrf.mxu0  ;;  %v1121_v48 = vpop.f32.mrf.mxu2 }
 0x191   :  { %v955_v8 = vadd.f32 %v1391_v18, %v954_v0  ;;  %v1067_v43 = vpop.f32.mrf.mxu1 }
 0x192   :  { %v1165_v33 = vpop.f32.mrf.mxu3 }
 0x193   :  { %v1064_v12 = vadd.f32 %v1063_v1, %v955_v8 }
 0x195   :  { %v1122_v61 = vadd.f32 %v1121_v48, %v1064_v12 }
 0x197   :  { %v1166_v4 = vadd.f32 %v1165_v33, %v1122_v61 }
 0x198   :  { %v962_v24 = vpop.f32.mrf.mxu0  ;;  %v1126_v51 = vpop.f32.mrf.mxu2 }
 0x199   :  { %v963_v38 = vadd.f32 %v1391_v18, %v962_v24  ;;  %v1281_v10 = vpop.f32.mrf.mxu1 }
 0x19a   :  { %v1171_v15 = vpop.f32.mrf.mxu3 }
 0x19b   :  { %v1068_v30 = vadd.f32 %v1067_v43, %v963_v38 }
 0x19d   :  { %v1127_v19 = vadd.f32 %v1126_v51, %v1068_v30 }
 0x19f   :  { %v1172_v29 = vadd.f32 %v1171_v15, %v1127_v19 }
 0x1a0   :  { %v1240_v40 = vpop.f32.mrf.mxu0  ;;  %v1244_v41 = vpop.f32.mrf.mxu2 }
 0x1a1   :  { %v1241_v36 = vadd.f32 %v1240_v40, %v1166_v4  ;;  %v1245_v52 = vadd.f32 %v1244_v41, %v1172_v29 }
 0x1a2   :  { %v1285_v44 = vpop.f32.mrf.mxu3 }
 0x1a3   :  { %v1282_v22 = vadd.f32 %v1281_v10, %v1241_v36  ;;  %v1286_v20 = vadd.f32 %v1285_v44, %v1245_v52 }
 0x1a5   :  { %v1288_v2 = vmax.f32 %v1282_v22, 0.0  ;;  %v1289_v14 = vmax.f32 %v1286_v20, 0.0 }
 0x1a7   :  { %v1290_v62 = vand.u32 2147483647, %v1288_v2  ;;  %v1291_v39 = vand.u32 2147483647, %v1289_v14 }
 0x1a9   :  { %1292 = vadd.xlane.f32.xlu1 %v1290_v62 }
 0x1b1   :  { %1294 = vadd.xlane.f32.xlu1 %v1291_v39 }
 0x21c   :  { %v1293_v34 = vpop.xlane.xlu1 %1292 }
 0x21d   :  { %v1296_v53 = vadd.f32 1e-08, %v1293_v34 }
 0x21f   :  { %1396 = vrcp.f32 %v1296_v53  ;;  %v1309_v47 = vand.u32 2147483648, %v1296_v53  ;;  %v1307_v28 = vand.u32 2147483647, %v1296_v53  ;;  %vm1303_vm9 = vweird.f32 %v1296_v53 }
 0x221   :  { %v1310_v13 = vor.u32 1.1754944e-38, %v1309_v47  ;;  %vm1308_vm11 = vcmp.eq.f32.partialorder %v1307_v28, 8.507059e+37 }
 0x224   :  { %v1295_v45 = vpop.xlane.xlu1 %1294 }
 0x225   :  { %v1397_v25 = vpop.eup %1396  ;;  %v1297_v50 = vadd.f32 1e-08, %v1295_v45 }
 0x226   :  { %v1299_v54 = vmul.f32 %v1397_v25, %v1296_v53  ;;  %vm1304_vm8 = vweird.f32 %v1397_v25 }
 0x227   :  { %1398 = vrcp.f32 %v1297_v50  ;;  %vm1305_vm10 = vmor %vm1303_vm9, %vm1304_vm8  ;;  %v1323_v3 = vand.u32 2147483648, %v1297_v50  ;;  %v1321_v31 = vand.u32 2147483647, %v1297_v50  ;;  %vm1317_vm13 = vweird.f32 %v1297_v50 }
 0x228   :  { %v1300_v26 = vsub.f32 1.0, %v1299_v54 }
 0x229   :  { %v1324_v60 = vor.u32 1.1754944e-38, %v1323_v3  ;;  %vm1322_vm15 = vcmp.eq.f32.partialorder %v1321_v31, 8.507059e+37 }
 0x22a   :  { %v1301_v63 = vmul.f32 %v1397_v25, %v1300_v26 }
 0x22c   :  { %v1302_v5 = vadd.f32 %v1397_v25, %v1301_v63 }
 0x22d   :  { %v1399_v42 = vpop.eup %1398 }
 0x22e   :  { %v1313_v55 = vmul.f32 %v1399_v42, %v1297_v50  ;;  %v1306_v32 = vsel %vm1305_vm10, %v1397_v25, %v1302_v5  ;;  %vm1318_vm12 = vweird.f32 %v1399_v42 }
 0x22f   :  { %v1311_v49 = vsel %vm1308_vm11, %v1310_v13, %v1306_v32  ;;  %vm1319_vm14 = vmor %vm1317_vm13, %vm1318_vm12 }
 0x230   :  { %v1314_v7 = vsub.f32 1.0, %v1313_v55  ;;  %v1326_v6 = vmul.f32 %v1311_v49, %v1288_v2 }
 0x232   :  { %v1315_v57 = vmul.f32 %v1399_v42, %v1314_v7  ;;  %1328 = vst [vmem:[#allocation8] sm:$0xff] %v1326_v6 }
 0x234   :  { %v1316_v37 = vadd.f32 %v1399_v42, %v1315_v57 }
 0x236   :  { %v1320_v21 = vsel %vm1319_vm14, %v1399_v42, %v1316_v37 }
 0x237   :  { %v1325_v16 = vsel %vm1322_vm15, %v1324_v60, %v1320_v21 }
 0x238   :  { %v1327_v17 = vmul.f32 %v1325_v16, %v1289_v14 }
 0x23a   :  { %1329 = vst [vmem:[#allocation8 + $0x8] sm:$0xff] %v1327_v17 }
 0x23b   :  { %1342 = dma.vmem_to_hbm [thread:$0]  %s1335_s12, 256, %s1337_s15, [#allocation4], %s1503_s26, %s1503_s26, %s1504_s27  }
 0x23c   :  { %1500 = dma.done.wait [#allocation4], 256  }
 0x23d   :  { %1501 = vsyncadd [#allocation4], 4294967040 }
 0x23e   :  { %1347 = vsyncpa [#allocation3], 1 }
 0x23f   :  { %1348 = vsyncpa [#allocation6], 1 }
 0x240   :  { %1349 = vsyncpa [#allocation4], 1 }

</bundles_post_ra>
